<compile_context>
chip_gen: v6e
topology: v6e:2x2x1
jax: 0.10.0
libtpu: 0.0.40
codegen_flags: <defaults>
</compile_context>

<pallas_src>
import jax
import jax.numpy as jnp
from jax import lax
from jax.experimental import pallas as pl
from jax.experimental.pallas import tpu as pltpu


# ---------------------------------------------------------------------------
# Per-tile fused kernel: antithetic interpolation + (global-mean) centering +
# velocity MLP on both branches + antithetic velocity loss partial sum.
# ---------------------------------------------------------------------------
def _velocity_loss_tile_kernel(t_ref, x0_ref, x1_ref, z_ref,
                               mxtp_ref, mxtm_ref,
                               w1x_ref, w1t_ref, b1_ref, w2_ref, b2_ref,
                               partial_ref):
    t = t_ref[...]                                    # (TILE_N, 1) f32
    x0 = x0_ref[...]                                  # (TILE_N, D) f32
    x1 = x1_ref[...]
    z = z_ref[...]

    s = jnp.maximum(t * (1.0 - t), 1e-6)              # clamp keeps rsqrt finite at t->0/1
    gamma = jnp.sqrt(s)                                # EUP slot
    gamma_dot = 0.5 * (1.0 - 2.0 * t) * lax.rsqrt(s)   # EUP slot

    base = (1.0 - t) * x0 + t * x1
    gz = gamma * z
    # Batch-wide (all-atom) column means are precomputed in the wrapper so tiling does not
    # change the centering semantics of `xtp - mean(xtp, dim=0)`.
    xtp = base + gz - mxtp_ref[...]
    xtm = base - gz - mxtm_ref[...]

    # Velocity MLP, both antithetic branches as two dots against the resident weights
    # (no in-kernel concatenation). Weights are bf16, accumulation in f32.
    w1x = w1x_ref[...]                                 # (D, H) bf16
    w2 = w2_ref[...]                                   # (H, D) bf16
    tb = t * w1t_ref[...] + b1_ref[...]                # (TILE_N, H) f32, shared by branches

    def mlp(xt):
        h = jnp.dot(xt.astype(jnp.bfloat16), w1x, preferred_element_type=jnp.float32)
        h = jnp.maximum(h + tb, 0.0)
        return jnp.dot(h.astype(jnp.bfloat16), w2,
                       preferred_element_type=jnp.float32) + b2_ref[...]

    bp = mlp(xtp)                                      # b(x_t^+, t)
    bm = mlp(xtm)                                      # b(x_t^-, t)

    # Fused antithetic loss energy -> single reduction (instead of 4 row reductions).
    dtI = x1 - x0                                      # d/dt of the linear interpolant
    gdz = gamma_dot * z
    e = 0.5 * (bp * bp + bm * bm) - (dtI + gdz) * bp - (dtI - gdz) * bm
    tile_sum = jnp.sum(e)                              # scalar partial sum for this tile

    # Lane-dense unmasked store of the per-tile partial.
    partial_ref[...] = jnp.broadcast_to(tile_sum, partial_ref.shape)


def _pick_tile_n(n, cap=512):
    for cand in (cap, 256, 128, 64, 32, 16, 8):
        if cand <= n and n % cand == 0:
            return cand
    return n  # single tile fallback (block == full array is always legal)


def fused_base_velocity_loss(t, z, x0, x1, params, *, tile_n=None):
    """N-tiled fused pallas_call; per-tile partial sums, final mean in the wrapper."""
    w1x, w1t, b1, w2, b2 = params
    N, D = x0.shape
    H = w1x.shape[1]

    if tile_n is None:
        tile_n = _pick_tile_n(N)
    assert N % tile_n == 0, f"N={N} must be divisible by tile_n={tile_n}"
    assert tile_n % 8 == 0 or tile_n == N, "tile_n must be sublane-aligned"
    num_tiles = N // tile_n

    # Batch-wide column means (spec: center with the mean over ALL atoms) -- one cheap
    # fused XLA pass, passed to every tile as (1, D) constants.
    s = jnp.maximum(t * (1.0 - t), 1e-6)
    mean_base = jnp.mean((1.0 - t) * x0 + t * x1, axis=0, keepdims=True)
    mean_gz = jnp.mean(jnp.sqrt(s) * z, axis=0, keepdims=True)
    mean_xtp = mean_base + mean_gz
    mean_xtm = mean_base - mean_gz

    w1x_bf = w1x.astype(jnp.bfloat16)
    w2_bf = w2.astype(jnp.bfloat16)

    row = lambda i: (i, 0)     # tiled over N
    const = lambda i: (0, 0)   # resident across the grid (weights / global means)

    partials = pl.pallas_call(
        _velocity_loss_tile_kernel,
        out_shape=jax.ShapeDtypeStruct((num_tiles, 8, 128), jnp.float32),
        grid=(num_tiles,),
        in_specs=[
            pl.BlockSpec((tile_n, 1), row),    # per-node t
            pl.BlockSpec((tile_n, D), row),    # x0
            pl.BlockSpec((tile_n, D), row),    # x1
            pl.BlockSpec((tile_n, D), row),    # z
            pl.BlockSpec((1, D), const),       # mean(xtp, 0)   (batch-wide)
            pl.BlockSpec((1, D), const),       # mean(xtm, 0)   (batch-wide)
            pl.BlockSpec((D, H), const),       # W1 rows acting on x_t (bf16)
            pl.BlockSpec((1, H), const),       # W1 row acting on t
            pl.BlockSpec((1, H), const),       # b1
            pl.BlockSpec((H, D), const),       # W2 (bf16)
            pl.BlockSpec((1, D), const),       # b2
        ],
        out_specs=pl.BlockSpec((1, 8, 128), lambda i: (i, 0, 0)),
        compiler_params=pltpu.CompilerParams(
            dimension_semantics=("parallel",),          # independent tiles -> megacore on v7x
            vmem_limit_bytes=32 * 1024 * 1024,          # explicit, safe on v5e/v6e/v7x
        ),
    )(t, x0, x1, z, mean_xtp, mean_xtm, w1x_bf, w1t, b1, w2_bf, b2)

    # Per-tile partial sums (lane 0) -> final mean over all atoms.
    return jnp.sum(partials[:, 0, 0]) / N


# ---------------------------------------------------------------------------
# Forward pass of BaseVelocityLoss (glue in plain JAX)
# ---------------------------------------------------------------------------
def init_velocity_params(key, d_feat, hidden, d_out):
    k1, k2, k3 = jax.random.split(key, 3)
    # First-layer weight split into x-rows and t-row: mathematically identical to a
    # (d_feat+1, hidden) weight applied to concat([x_t, t], -1).
    scale1 = 1.0 / jnp.sqrt(d_feat + 1.0)
    w1x = jax.random.normal(k1, (d_feat, hidden), jnp.float32) * scale1
    w1t = jax.random.normal(k3, (1, hidden), jnp.float32) * scale1
    b1 = jnp.zeros((1, hidden), jnp.float32)
    w2 = jax.random.normal(k2, (hidden, d_out), jnp.float32) / jnp.sqrt(float(hidden))
    b2 = jnp.zeros((1, d_out), jnp.float32)
    return w1x, w1t, b1, w2, b2


def base_velocity_loss_forward(key, x0, x1, n_graphs, atoms_per_graph,
                               mlp_params, t_distr="uniform", tile_n=None):
    assert t_distr in ("uniform", "beta"), f"Invalid time distribution: {t_distr}"
    kt, kz = jax.random.split(key)
    if t_distr == "uniform":
        t_graph = jax.random.uniform(kt, (n_graphs,), dtype=jnp.float32)
    else:
        t_graph = jax.random.beta(kt, 0.5, 0.5, (n_graphs,)).astype(jnp.float32)
    # one t per graph, repeated over that graph's atoms (torch.rand(1).repeat(n_atoms))
    t = jnp.repeat(t_graph, atoms_per_graph)[:, None]
    t = jnp.clip(t, 1e-3, 1.0 - 1e-3)                  # keep gamma'(t) finite
    z = jax.random.normal(kz, x0.shape, dtype=jnp.float32)   # interpolant noise
    return fused_base_velocity_loss(t, z, x0, x1, mlp_params, tile_n=tile_n)


if __name__ == "__main__":
    key = jax.random.PRNGKey(0)
    kx0, kx1, kp, kfwd = jax.random.split(key, 4)

    n_graphs, atoms_per_graph = 4, 32
    N = n_graphs * atoms_per_graph      # 128 atoms total
    D = 16                              # node feature dim
    H = 32                              # MLP hidden dim

    x0 = jax.random.normal(kx0, (N, D), dtype=jnp.float32)
    x1 = jax.random.normal(kx1, (N, D), dtype=jnp.float32)
    params = init_velocity_params(kp, D, H, D)

    # tile_n=32 -> grid=(4,), exercising the tiled / per-tile-partial path.
    fwd = jax.jit(lambda k, a, b, p: base_velocity_loss_forward(
        k, a, b, n_graphs, atoms_per_graph, p, tile_n=32))
    loss = fwd(kfwd, x0, x1, params)
    jax.block_until_ready(loss)
    assert loss.shape == () and bool(jnp.isfinite(loss))
    print("KERNEL_OK")
</pallas_src>

<mosaic_0001>
module attributes {stable_mosaic.version = 11 : i64} {
  func.func @_velocity_loss_tile_kernel(%arg0: i32, %arg1: memref<32x1xf32, #tpu.memory_space<vmem>>, %arg2: memref<32x16xf32, #tpu.memory_space<vmem>>, %arg3: memref<32x16xf32, #tpu.memory_space<vmem>>, %arg4: memref<32x16xf32, #tpu.memory_space<vmem>>, %arg5: memref<1x16xf32, #tpu.memory_space<vmem>>, %arg6: memref<1x16xf32, #tpu.memory_space<vmem>>, %arg7: memref<16x32xbf16, #tpu.memory_space<vmem>>, %arg8: memref<1x32xf32, #tpu.memory_space<vmem>>, %arg9: memref<1x32xf32, #tpu.memory_space<vmem>>, %arg10: memref<32x16xbf16, #tpu.memory_space<vmem>>, %arg11: memref<1x16xf32, #tpu.memory_space<vmem>>, %arg12: memref<1x8x128xf32, #tpu.memory_space<vmem>>) attributes {dimension_semantics = [#tpu.dimension_semantics<parallel>], iteration_bounds = array<i64: 4>, scalar_prefetch = 0 : i64, scratch_operands = 0 : i64, tpu.core_type = #tpu.core_type<tc>, window_params = [{transform_indices = @transform_0, window_bounds = array<i64: 32, 1>}, {transform_indices = @transform_1, window_bounds = array<i64: 32, 16>}, {transform_indices = @transform_2, window_bounds = array<i64: 32, 16>}, {transform_indices = @transform_3, window_bounds = array<i64: 32, 16>}, {pipeline_mode = #tpu.pipeline_mode<synchronous>, transform_indices = @transform_4, window_bounds = array<i64: 1, 16>}, {pipeline_mode = #tpu.pipeline_mode<synchronous>, transform_indices = @transform_5, window_bounds = array<i64: 1, 16>}, {pipeline_mode = #tpu.pipeline_mode<synchronous>, transform_indices = @transform_6, window_bounds = array<i64: 16, 32>}, {pipeline_mode = #tpu.pipeline_mode<synchronous>, transform_indices = @transform_7, window_bounds = array<i64: 1, 32>}, {pipeline_mode = #tpu.pipeline_mode<synchronous>, transform_indices = @transform_8, window_bounds = array<i64: 1, 32>}, {pipeline_mode = #tpu.pipeline_mode<synchronous>, transform_indices = @transform_9, window_bounds = array<i64: 32, 16>}, {pipeline_mode = #tpu.pipeline_mode<synchronous>, transform_indices = @transform_10, window_bounds = array<i64: 1, 16>}, {transform_indices = @transform_11, window_bounds = array<i64: 1, 8, 128>}]} {
    %c0 = arith.constant 0 : index
    %c0_0 = arith.constant 0 : index
    %0 = vector.load %arg1[%c0, %c0_0] : memref<32x1xf32, #tpu.memory_space<vmem>>, vector<32x1xf32>
    %c0_1 = arith.constant 0 : index
    %c0_2 = arith.constant 0 : index
    %1 = vector.load %arg2[%c0_1, %c0_2] : memref<32x16xf32, #tpu.memory_space<vmem>>, vector<32x16xf32>
    %c0_3 = arith.constant 0 : index
    %c0_4 = arith.constant 0 : index
    %2 = vector.load %arg3[%c0_3, %c0_4] : memref<32x16xf32, #tpu.memory_space<vmem>>, vector<32x16xf32>
    %c0_5 = arith.constant 0 : index
    %c0_6 = arith.constant 0 : index
    %3 = vector.load %arg4[%c0_5, %c0_6] : memref<32x16xf32, #tpu.memory_space<vmem>>, vector<32x16xf32>
    %cst = arith.constant 1.000000e+00 : f32
    %4 = vector.broadcast %cst : f32 to vector<32x1xf32>
    %5 = arith.subf %4, %0 : vector<32x1xf32>
    %6 = arith.mulf %0, %5 : vector<32x1xf32>
    %cst_7 = arith.constant 9.99999997E-7 : f32
    %7 = vector.broadcast %cst_7 : f32 to vector<32x1xf32>
    %8 = arith.maximumf %6, %7 : vector<32x1xf32>
    %9 = math.sqrt %8 : vector<32x1xf32>
    %cst_8 = arith.constant 2.000000e+00 : f32
    %10 = vector.broadcast %cst_8 : f32 to vector<32x1xf32>
    %11 = arith.mulf %10, %0 : vector<32x1xf32>
    %cst_9 = arith.constant 1.000000e+00 : f32
    %12 = vector.broadcast %cst_9 : f32 to vector<32x1xf32>
    %13 = arith.subf %12, %11 : vector<32x1xf32>
    %cst_10 = arith.constant 5.000000e-01 : f32
    %14 = vector.broadcast %cst_10 : f32 to vector<32x1xf32>
    %15 = arith.mulf %14, %13 : vector<32x1xf32>
    %16 = math.rsqrt %8 : vector<32x1xf32>
    %17 = arith.mulf %15, %16 : vector<32x1xf32>
    %cst_11 = arith.constant 1.000000e+00 : f32
    %18 = vector.broadcast %cst_11 : f32 to vector<32x1xf32>
    %19 = arith.subf %18, %0 : vector<32x1xf32>
    %20 = vector.broadcast %19 : vector<32x1xf32> to vector<32x16xf32>
    %21 = arith.mulf %20, %1 : vector<32x16xf32>
    %22 = vector.broadcast %0 : vector<32x1xf32> to vector<32x16xf32>
    %23 = arith.mulf %22, %2 : vector<32x16xf32>
    %24 = arith.addf %21, %23 : vector<32x16xf32>
    %25 = vector.broadcast %9 : vector<32x1xf32> to vector<32x16xf32>
    %26 = arith.mulf %25, %3 : vector<32x16xf32>
    %27 = arith.addf %24, %26 : vector<32x16xf32>
    %c0_12 = arith.constant 0 : index
    %c0_13 = arith.constant 0 : index
    %28 = vector.load %arg5[%c0_12, %c0_13] : memref<1x16xf32, #tpu.memory_space<vmem>>, vector<1x16xf32>
    %29 = vector.broadcast %28 : vector<1x16xf32> to vector<32x16xf32>
    %30 = arith.subf %27, %29 : vector<32x16xf32>
    %31 = arith.subf %24, %26 : vector<32x16xf32>
    %c0_14 = arith.constant 0 : index
    %c0_15 = arith.constant 0 : index
    %32 = vector.load %arg6[%c0_14, %c0_15] : memref<1x16xf32, #tpu.memory_space<vmem>>, vector<1x16xf32>
    %33 = vector.broadcast %32 : vector<1x16xf32> to vector<32x16xf32>
    %34 = arith.subf %31, %33 : vector<32x16xf32>
    %c0_16 = arith.constant 0 : index
    %c0_17 = arith.constant 0 : index
    %35 = vector.load %arg7[%c0_16, %c0_17] : memref<16x32xbf16, #tpu.memory_space<vmem>>, vector<16x32xbf16>
    %c0_18 = arith.constant 0 : index
    %c0_19 = arith.constant 0 : index
    %36 = vector.load %arg10[%c0_18, %c0_19] : memref<32x16xbf16, #tpu.memory_space<vmem>>, vector<32x16xbf16>
    %c0_20 = arith.constant 0 : index
    %c0_21 = arith.constant 0 : index
    %37 = vector.load %arg8[%c0_20, %c0_21] : memref<1x32xf32, #tpu.memory_space<vmem>>, vector<1x32xf32>
    %38 = vector.broadcast %0 : vector<32x1xf32> to vector<32x32xf32>
    %39 = vector.broadcast %37 : vector<1x32xf32> to vector<32x32xf32>
    %40 = arith.mulf %38, %39 : vector<32x32xf32>
    %c0_22 = arith.constant 0 : index
    %c0_23 = arith.constant 0 : index
    %41 = vector.load %arg9[%c0_22, %c0_23] : memref<1x32xf32, #tpu.memory_space<vmem>>, vector<1x32xf32>
    %42 = vector.broadcast %41 : vector<1x32xf32> to vector<32x32xf32>
    %43 = arith.addf %40, %42 : vector<32x32xf32>
    %44 = arith.truncf %30 : vector<32x16xf32> to vector<32x16xbf16>
    %cst_24 = arith.constant dense<0.000000e+00> : vector<32x32xf32>
    %45 = tpu.matmul %44, %35, %cst_24 {dimension_numbers = #tpu.dot_dimension_numbers<[1], [0], [0], [1], [0, 0, 1, 1], [], []>} : vector<32x16xbf16>, vector<16x32xbf16>, vector<32x32xf32> -> vector<32x32xf32>
    %46 = arith.addf %45, %43 : vector<32x32xf32>
    %cst_25 = arith.constant 0.000000e+00 : f32
    %47 = vector.broadcast %cst_25 : f32 to vector<32x32xf32>
    %48 = arith.maximumf %46, %47 : vector<32x32xf32>
    %49 = arith.truncf %48 : vector<32x32xf32> to vector<32x32xbf16>
    %cst_26 = arith.constant dense<0.000000e+00> : vector<32x16xf32>
    %50 = tpu.matmul %49, %36, %cst_26 {dimension_numbers = #tpu.dot_dimension_numbers<[1], [0], [0], [1], [0, 0, 1, 1], [], []>} : vector<32x32xbf16>, vector<32x16xbf16>, vector<32x16xf32> -> vector<32x16xf32>
    %c0_27 = arith.constant 0 : index
    %c0_28 = arith.constant 0 : index
    %51 = vector.load %arg11[%c0_27, %c0_28] : memref<1x16xf32, #tpu.memory_space<vmem>>, vector<1x16xf32>
    %52 = vector.broadcast %51 : vector<1x16xf32> to vector<32x16xf32>
    %53 = arith.addf %50, %52 : vector<32x16xf32>
    %54 = arith.truncf %34 : vector<32x16xf32> to vector<32x16xbf16>
    %cst_29 = arith.constant dense<0.000000e+00> : vector<32x32xf32>
    %55 = tpu.matmul %54, %35, %cst_29 {dimension_numbers = #tpu.dot_dimension_numbers<[1], [0], [0], [1], [0, 0, 1, 1], [], []>} : vector<32x16xbf16>, vector<16x32xbf16>, vector<32x32xf32> -> vector<32x32xf32>
    %56 = arith.addf %55, %43 : vector<32x32xf32>
    %cst_30 = arith.constant 0.000000e+00 : f32
    %57 = vector.broadcast %cst_30 : f32 to vector<32x32xf32>
    %58 = arith.maximumf %56, %57 : vector<32x32xf32>
    %59 = arith.truncf %58 : vector<32x32xf32> to vector<32x32xbf16>
    %cst_31 = arith.constant dense<0.000000e+00> : vector<32x16xf32>
    %60 = tpu.matmul %59, %36, %cst_31 {dimension_numbers = #tpu.dot_dimension_numbers<[1], [0], [0], [1], [0, 0, 1, 1], [], []>} : vector<32x32xbf16>, vector<32x16xbf16>, vector<32x16xf32> -> vector<32x16xf32>
    %c0_32 = arith.constant 0 : index
    %c0_33 = arith.constant 0 : index
    %61 = vector.load %arg11[%c0_32, %c0_33] : memref<1x16xf32, #tpu.memory_space<vmem>>, vector<1x16xf32>
    %62 = vector.broadcast %61 : vector<1x16xf32> to vector<32x16xf32>
    %63 = arith.addf %60, %62 : vector<32x16xf32>
    %64 = arith.subf %2, %1 : vector<32x16xf32>
    %65 = vector.broadcast %17 : vector<32x1xf32> to vector<32x16xf32>
    %66 = arith.mulf %65, %3 : vector<32x16xf32>
    %67 = arith.mulf %53, %53 : vector<32x16xf32>
    %68 = arith.mulf %63, %63 : vector<32x16xf32>
    %69 = arith.addf %67, %68 : vector<32x16xf32>
    %cst_34 = arith.constant 5.000000e-01 : f32
    %70 = vector.broadcast %cst_34 : f32 to vector<32x16xf32>
    %71 = arith.mulf %70, %69 : vector<32x16xf32>
    %72 = arith.addf %64, %66 : vector<32x16xf32>
    %73 = arith.mulf %72, %53 : vector<32x16xf32>
    %74 = arith.subf %71, %73 : vector<32x16xf32>
    %75 = arith.subf %64, %66 : vector<32x16xf32>
    %76 = arith.mulf %75, %63 : vector<32x16xf32>
    %77 = arith.subf %74, %76 : vector<32x16xf32>
    %78 = vector.shape_cast %77 : vector<32x16xf32> to vector<1x32x16xf32>
    %cst_35 = arith.constant dense<0.000000e+00> : vector<1xf32>
    %79 = vector.multi_reduction <add>, %78, %cst_35 [1, 2] : vector<1x32x16xf32> to vector<1xf32>
    %80 = vector.shape_cast %79 : vector<1xf32> to vector<1x1x1xf32>
    %81 = vector.extract %80[0, 0, 0] : f32 from vector<1x1x1xf32>
    %82 = vector.broadcast %81 : f32 to vector<1x8x128xf32>
    %c0_36 = arith.constant 0 : index
    %c0_37 = arith.constant 0 : index
    %c0_38 = arith.constant 0 : index
    %83 = vector.load %arg12[%c0_36, %c0_37, %c0_38] : memref<1x8x128xf32, #tpu.memory_space<vmem>>, vector<1x8x128xf32>
    tpu.vector_store %arg12[%c0_36, %c0_37, %c0_38], %82 {strides = array<i32>} : memref<1x8x128xf32, #tpu.memory_space<vmem>>, vector<1x8x128xf32>,
    return
  }
  func.func @transform_0(%arg0: i32) -> (i32, i32) {
    %c0_i32 = arith.constant 0 : i32
    %c0_i32_0 = arith.constant 0 : i32
    return %arg0, %c0_i32 : i32, i32
  }
  func.func @transform_1(%arg0: i32) -> (i32, i32) {
    %c0_i32 = arith.constant 0 : i32
    %c0_i32_0 = arith.constant 0 : i32
    return %arg0, %c0_i32 : i32, i32
  }
  func.func @transform_2(%arg0: i32) -> (i32, i32) {
    %c0_i32 = arith.constant 0 : i32
    %c0_i32_0 = arith.constant 0 : i32
    return %arg0, %c0_i32 : i32, i32
  }
  func.func @transform_3(%arg0: i32) -> (i32, i32) {
    %c0_i32 = arith.constant 0 : i32
    %c0_i32_0 = arith.constant 0 : i32
    return %arg0, %c0_i32 : i32, i32
  }
  func.func @transform_4(%arg0: i32) -> (i32, i32) {
    %c0_i32 = arith.constant 0 : i32
    %c0_i32_0 = arith.constant 0 : i32
    %c0_i32_1 = arith.constant 0 : i32
    return %c0_i32, %c0_i32_0 : i32, i32
  }
  func.func @transform_5(%arg0: i32) -> (i32, i32) {
    %c0_i32 = arith.constant 0 : i32
    %c0_i32_0 = arith.constant 0 : i32
    %c0_i32_1 = arith.constant 0 : i32
    return %c0_i32, %c0_i32_0 : i32, i32
  }
  func.func @transform_6(%arg0: i32) -> (i32, i32) {
    %c0_i32 = arith.constant 0 : i32
    %c0_i32_0 = arith.constant 0 : i32
    %c0_i32_1 = arith.constant 0 : i32
    return %c0_i32, %c0_i32_0 : i32, i32
  }
  func.func @transform_7(%arg0: i32) -> (i32, i32) {
    %c0_i32 = arith.constant 0 : i32
    %c0_i32_0 = arith.constant 0 : i32
    %c0_i32_1 = arith.constant 0 : i32
    return %c0_i32, %c0_i32_0 : i32, i32
  }
  func.func @transform_8(%arg0: i32) -> (i32, i32) {
    %c0_i32 = arith.constant 0 : i32
    %c0_i32_0 = arith.constant 0 : i32
    %c0_i32_1 = arith.constant 0 : i32
    return %c0_i32, %c0_i32_0 : i32, i32
  }
  func.func @transform_9(%arg0: i32) -> (i32, i32) {
    %c0_i32 = arith.constant 0 : i32
    %c0_i32_0 = arith.constant 0 : i32
    %c0_i32_1 = arith.constant 0 : i32
    return %c0_i32, %c0_i32_0 : i32, i32
  }
  func.func @transform_10(%arg0: i32) -> (i32, i32) {
    %c0_i32 = arith.constant 0 : i32
    %c0_i32_0 = arith.constant 0 : i32
    %c0_i32_1 = arith.constant 0 : i32
    return %c0_i32, %c0_i32_0 : i32, i32
  }
  func.func @transform_11(%arg0: i32) -> (i32, i32, i32) {
    %c0_i32 = arith.constant 0 : i32
    %c0_i32_0 = arith.constant 0 : i32
    %c0_i32_1 = arith.constant 0 : i32
    return %arg0, %c0_i32, %c0_i32_0 : i32, i32, i32
  }
}

</mosaic_0001>

<bundles_post_ra>
// kernel: _lambda_.1
= control target key start
LH: loop header
LB: loop body
LE: loop exit
PB: predicated region body
PF: predicated region fallthrough
CT: control target
= control target key end

     0   :  { %s1269_s17 = smov 0   ;;  %s1415_s0 = inlined_call_operand.vmem [shape: f32[128,1], index: 0, kind: input, shape index: {}]   ;;  %s1416_s1 = inlined_call_operand.vmem [shape: f32[128,16], index: 1, kind: input, shape index: {}]   ;;  %s1417_s2 = inlined_call_operand.vmem [shape: f32[128,16], index: 2, kind: input, shape index: {}]   ;;  %s1418_s3 = inlined_call_operand.vmem [shape: f32[128,16], index: 3, kind: input, shape index: {}]   ;;  %s1419_s4 = inlined_call_operand.vmem [shape: f32[1,16], index: 4, kind: input, shape index: {}]   ;;  %s1420_s5 = inlined_call_operand.vmem [shape: f32[1,16], index: 5, kind: input, shape index: {}]   ;;  %s1421_s6 = inlined_call_operand.vmem [shape: bf16[16,32], index: 6, kind: input, shape index: {}]   ;;  %s1422_s7 = inlined_call_operand.vmem [shape: f32[1,32], index: 7, kind: input, shape index: {}]   ;;  %s1423_s8 = inlined_call_operand.vmem [shape: f32[1,32], index: 8, kind: input, shape index: {}]   ;;  %s1424_s9 = inlined_call_operand.vmem [shape: bf16[32,16], index: 9, kind: input, shape index: {}]   ;;  %s1425_s10 = inlined_call_operand.vmem [shape: f32[1,16], index: 10, kind: input, shape index: {}]   ;;  %s1426_s11 = inlined_call_operand.vmem [shape: f32[4,8,128], index: 11, kind: output, shape index: {}]  }
   0x1 LB: > { %s1275_s18 = sadd.s32 4294967295, %s1206_s17   ;;  %p1106_p0 = scmp.ge.s32.totalorder %s1206_s17, 1  ;;  %s1206_s17 = sphi %s1269_s17, %s21_s17  }
   0x2   : > { %p371_p1 = scmp.lt.s32.totalorder %s1206_s17, 5 }
   0x4   : > { %p372_p2 = pnand %p1106_p0, %p371_p1 }
   0x5   : > { %s1107_s19 = sshll.u32 (!%p372_p2), %s1275_s18, 2  ;;  %p449_p4 = scmp.lt.s32.totalorder (!%p372_p2), %s1275_s18, 3 }
   0x6   : > { %375 = sbr.rel (%p372_p2) target bundleno = 810 (0x32a), region = 64  ;;  %p426_p3 = scmp.lt.s32.totalorder (!%p372_p2), %s1107_s19, 15 }
   0xb   : > { %v1208_v0 = vmov 0   ;;  %s1428_s19 = smov (!%p426_p3, %s1107_s19), 15  ;;  %v1292_v47 = vld [vmem:[%s1421_s6] sm:$0xff]   ;;  %vm672_vm8 = vcmask 130048   ;;  %vm753_vm9 = vcmask 261120   ;;  %s1430_s18 = smov (!%p449_p4, %s1275_s18), 3 }
   0xc   : > { %1187 = vset.pattern.permute.xlu1 %v1208_v0  ;;  %1188 = vset.pattern.permute.xlu0 %v1208_v0  ;;  %s1280_s20 = sshll.u32 %s1428_s19, 3  ;;  %s1115_s13 = sshll.u32 %s1430_s18, 3 }
   0xd   : > { %s429_s23 = scalar_lea.vmem %s1415_s0, %s1280_s20  ;;  %1148 = vmatprep.subr.bf16.mxu0 %v1292_v47  ;;  %s441_s28 = scalar_lea.vmem %s1417_s2, %s1280_s20 }
   0xe   : > { %v454_v1 = vld [vmem:[%s429_s23] sm:$0xff]  ;;  %v455_v2 = vld [vmem:[%s429_s23 + $0x8] sm:$0xff]  ;;  %v457_v3 = vld [vmem:[%s429_s23 + $0x18] sm:$0xff]  ;;  %1149 = vmatpush3.bf16.msra.mxu0 %v1292_v47  ;;  %s435_s12 = scalar_lea.vmem %s1416_s1, %s1280_s20  ;;  %s447_s15 = scalar_lea.vmem %s1418_s3, %s1280_s20 }
   0xf   : > { %556 = vperm.xlu1 %1187, %v454_v1   ;;  %v470_v4 = vsub.f32 1.0, %v454_v1  ;;  %v471_v5 = vsub.f32 1.0, %v455_v2  ;;  %v473_v6 = vsub.f32 1.0, %v457_v3  ;;  %v456_v7 = vld [vmem:[%s429_s23 + $0x10] sm:$0xff]  ;;  %v511_v17 = vmul.f32 2.0, %v455_v2  ;;  %1162 = vmatprep.subr.bf16.mxu0 %v1292_v47  ;;  %v1309_v60 = vld [vmem:[%s441_s28] sm:$0xff]  ;;  %s452_s16 = scalar_lea.vmem %s1426_s11, %s1115_s13 }
  0x10   : > { %v472_v8 = vsub.f32 1.0, %v456_v7  ;;  %v510_v18 = vmul.f32 2.0, %v454_v1  ;;  %v513_v20 = vmul.f32 2.0, %v457_v3  ;;  %v512_v21 = vmul.f32 2.0, %v456_v7  ;;  %v1311_v61 = vld [vmem:[%s435_s12] sm:$0xff]  ;;  %v1313_v62 = vld [vmem:[%s441_s28 + $0x8] sm:$0xff] }
  0x11   : > { %532 = vperm.xlu0 %1188, %v470_v4   ;;  %v474_v9 = vmul.f32 %v470_v4, %v454_v1  ;;  %v475_v10 = vmul.f32 %v471_v5, %v455_v2  ;;  %v477_v11 = vmul.f32 %v473_v6, %v457_v3  ;;  %v515_v19 = vsub.f32 1.0, %v511_v17  ;;  %v1315_v63 = vld [vmem:[%s435_s12 + $0x8] sm:$0xff] }
  0x12   : > { %v476_v12 = vmul.f32 %v472_v8, %v456_v7  ;;  %v514_v24 = vsub.f32 1.0, %v510_v18  ;;  %v516_v41 = vsub.f32 1.0, %v512_v21  ;;  %v517_v44 = vsub.f32 1.0, %v513_v20  ;;  %v1116_v21 = vld [vmem:[%s1419_s4] ss:$0 sm:$0xff] }
  0x13   : > { %v478_v13 = vmax.f32 %v474_v9, 1e-06  ;;  %561 = vperm.xlu1 %1187, %v455_v2   ;;  %v479_v14 = vmax.f32 %v475_v10, 1e-06  ;;  %v481_v15 = vmax.f32 %v477_v11, 1e-06 }
  0x14   : > { %v480_v16 = vmax.f32 %v476_v12, 1e-06  ;;  %v518_v40 = vmul.f32 0.5, %v514_v24  ;;  %v519_v43 = vmul.f32 0.5, %v515_v19  ;;  %v520_v49 = vmul.f32 0.5, %v516_v41  ;;  %v1337_v9 = vld [vmem:[%s435_s12 + $0x10] sm:$0xff] }
  0x15   : > { %1192 = vrsqrt.f32 %v478_v13  ;;  %537 = vperm.xlu0 %1188, %v471_v5   ;;  %vm491_vm0 = vcmp.eq.f32.partialorder %v479_v14, inf  ;;  %vm484_vm1 = vcmp.eq.f32.partialorder %v478_v13, inf  ;;  %v487_v23 = vand.u32 2147483648, %v478_v13  ;;  %v1339_v10 = vld [vmem:[%s447_s15 + $0x8] sm:$0xff]  ;;  %v1355_v24 = vld [vmem:[%s447_s15 + $0x18] sm:$0xff] }
  0x16   : > { %1194 = vrsqrt.f32 %v479_v14  ;;  %vm493_vm2 = vcmp.eq.f32.partialorder %v479_v14, 0.0  ;;  %v494_v26 = vand.u32 2147483648, %v479_v14  ;;  %vm486_vm3 = vcmp.eq.f32.partialorder %v478_v13, 0.0 }
  0x17   : > { %547 = vperm.xlu1 %1187, %v473_v6   ;;  %1196 = vrsqrt.f32 %v481_v15  ;;  %vm505_vm4 = vcmp.eq.f32.partialorder %v481_v15, inf  ;;  %vm507_vm5 = vcmp.eq.f32.partialorder %v481_v15, 0.0  ;;  %v508_v30 = vand.u32 2147483648, %v481_v15 }
  0x18   : > { %1198 = vrsqrt.f32 %v480_v16  ;;  %vm498_vm6 = vcmp.eq.f32.partialorder %v480_v16, inf  ;;  %v501_v34 = vand.u32 2147483648, %v480_v16  ;;  %vm500_vm7 = vcmp.eq.f32.partialorder %v480_v16, 0.0 }
  0x19   : > { %542 = vperm.xlu0 %1188, %v472_v8   ;;  %v521_v51 = vmul.f32 0.5, %v517_v44  ;;  %v1335_v8 = vld [vmem:[%s441_s28 + $0x18] sm:$0xff] }
  0x1b   : > { %571 = vperm.xlu1 %1187, %v457_v3   ;;  %v1326_v3 = vld [vmem:[%s441_s28 + $0x10] sm:$0xff] }
  0x1d   : > { %566 = vperm.xlu0 %1188, %v456_v7   ;;  %v1333_v7 = vld [vmem:[%s447_s15] sm:$0xff] }
  0x22   : > { %v1193_v22 = vpop.eup %1192 }
  0x23   : > { %v1195_v25 = vpop.eup %1194  ;;  %v483_v27 = vmul.f32 %v1193_v22, %v478_v13  ;;  %v526_v48 = vmul.f32 %v1193_v22, %v518_v40  ;;  %v1353_v22 = vld [vmem:[%s447_s15 + $0x10] sm:$0xff] }
  0x24   : > { %v1197_v28 = vpop.eup %1196  ;;  %v490_v29 = vmul.f32 %v1195_v25, %v479_v14  ;;  %v527_v50 = vmul.f32 %v1195_v25, %v519_v43 }
  0x25   : > { %v1199_v31 = vpop.eup %1198  ;;  %v485_v32 = vsel %vm484_vm1, %v478_v13, %v483_v27  ;;  %v504_v33 = vmul.f32 %v1197_v28, %v481_v15  ;;  %v529_v53 = vmul.f32 %v1197_v28, %v521_v51 }
  0x26   : > { %v492_v35 = vsel %vm491_vm0, %v479_v14, %v490_v29  ;;  %v488_v36 = vsel %vm486_vm3, %v487_v23, %v485_v32  ;;  %v497_v37 = vmul.f32 %v1199_v31, %v480_v16  ;;  %v528_v52 = vmul.f32 %v1199_v31, %v520_v49  ;;  %v1343_v14 = vld [vmem:[%s435_s12 + $0x18] sm:$0xff] }
  0x27   : > { %v495_v38 = vsel %vm493_vm2, %v494_v26, %v492_v35  ;;  %584 = vperm.xlu0 %1188, %v488_v36   ;;  %v506_v39 = vsel %vm505_vm4, %v481_v15, %v504_v33  ;;  %v1117_v35 = vld [vmem:[%s1420_s5] ss:$0 sm:$0xff] }
  0x28   : > { %589 = vperm.xlu1 %1187, %v495_v38   ;;  %v499_v42 = vsel %vm498_vm6, %v480_v16, %v497_v37  ;;  %v509_v45 = vsel %vm507_vm5, %v508_v30, %v506_v39 }
  0x29   : > { %v502_v46 = vsel %vm500_vm7, %v501_v34, %v499_v42 }
  0x2b   : > { %594 = vperm.xlu0 %1188, %v502_v46  }
  0x2c   : > { %599 = vperm.xlu1 %1187, %v509_v45  }
  0x2f   : > { %933 = vperm.xlu0 %1188, %v526_v48  }
  0x30   : > { %938 = vperm.xlu1 %1187, %v527_v50  }
  0x33   : > { %943 = vperm.xlu0 %1188, %v528_v52  }
  0x34   : > { %948 = vperm.xlu1 %1187, %v529_v53   ;;  %v1190_v53 = vld [vmem:[%s1424_s9 + $0x8] sm:$0xff]  }
  0x35   : > { %1154 = vmatprep.subr.bf16.mxu1 %v1190_v53 }
  0x36   : > { %1155 = vmatpush3.bf16.msra.mxu1 %v1190_v53 }
  0x8a   : > { %v1297_v55 = vpop.permute.xlu1 %556 }
  0x8b   : > { %v574_v1 = vmul.f32 %v1297_v55, %v1309_v60 }
  0x8c   : > { %v533_v54 = vpop.permute.xlu0 %532 }
  0x8d   : > { %v550_v2 = vmul.f32 %v533_v54, %v1311_v61  ;;  %v1191_v54 = vld [vmem:[%s1424_s9] sm:$0xff]  }
  0x8e   : > { %v1299_v57 = vpop.permute.xlu1 %561  ;;  %1156 = vmatprep.subr.bf16.mxu1 %v1191_v54 }
  0x8f   : > { %v575_v5 = vmul.f32 %v1299_v57, %v1313_v62  ;;  %v578_v13 = vadd.f32 %v574_v1, %v550_v2  ;;  %1157 = vmatpush3.bf16.msra.mxu1 %v1191_v54  ;;  %v1119_v1 = vld [vmem:[%s1423_s8] ss:$0 sm:$0xff] }
  0x90   : > { %v538_v56 = vpop.permute.xlu0 %537  ;;  %1168 = vmatprep.subr.bf16.mxu1 %v1190_v53 }
  0x91   : > { %v551_v6 = vmul.f32 %v538_v56, %v1315_v63 }
  0x92   : > { %v548_v59 = vpop.permute.xlu1 %547 }
  0x93   : > { %v579_v17 = vadd.f32 %v575_v5, %v551_v6  ;;  %v553_v25 = vmul.f32 %v548_v59, %v1343_v14 }
  0x94   : > { %v543_v58 = vpop.permute.xlu0 %542 }
  0x95   : > { %v552_v18 = vmul.f32 %v543_v58, %v1337_v9 }
  0x96   : > { %v1328_v4 = vpop.permute.xlu1 %571 }
  0x97   : > { %v577_v19 = vmul.f32 %v1328_v4, %v1335_v8 }
  0x98   : > { %v1321_v0 = vpop.permute.xlu0 %566 }
  0x99   : > { %v576_v11 = vmul.f32 %v1321_v0, %v1326_v3  ;;  %v581_v34 = vadd.f32 %v577_v19, %v553_v25 }
  0x9b   : > { %v580_v26 = vadd.f32 %v576_v11, %v552_v18 }
  0xa2   : > { %v585_v12 = vpop.permute.xlu0 %584 }
  0xa3   : > { %v590_v15 = vpop.permute.xlu1 %589  ;;  %v602_v16 = vmul.f32 %v585_v12, %v1333_v7 }
  0xa4   : > { %v603_v20 = vmul.f32 %v590_v15, %v1339_v10 }
  0xa5   : > { %v606_v23 = vadd.f32 %v602_v16, %v578_v13  ;;  %v621_v30 = vsub.f32 %v578_v13, %v602_v16 }
  0xa6   : > { %v607_v27 = vadd.f32 %v603_v20, %v579_v17  ;;  %v595_v28 = vpop.permute.xlu0 %594  ;;  %v622_v29 = vsub.f32 %v579_v17, %v603_v20 }
  0xa7   : > { %v600_v31 = vpop.permute.xlu1 %599  ;;  %v604_v32 = vmul.f32 %v595_v28, %v1353_v22  ;;  %v617_v33 = vsub.f32 %v606_v23, %v1116_v21  ;;  %v632_v42 = vsub.f32 %v621_v30, %v1117_v35 }
  0xa8   : > { %v605_v36 = vmul.f32 %v600_v31, %v1355_v24  ;;  %v618_v37 = vsub.f32 %v607_v27, %v1116_v21  ;;  %v633_v41 = vsub.f32 %v622_v29, %v1117_v35 }
  0xa9   : > { %v608_v38 = vadd.f32 %v604_v32, %v580_v26  ;;  %v623_v46 = vsub.f32 %v580_v26, %v604_v32 }
  0xaa   : > { %v609_v39 = vadd.f32 %v605_v36, %v581_v34  ;;  %v664_v40 = vpack.c.bf16 %v618_v37, %v617_v33  ;;  %v624_v45 = vsub.f32 %v581_v34, %v605_v36  ;;  %v809_v49 = vpack.c.bf16 %v633_v41, %v632_v42  ;;  %v934_v42 = vpop.permute.xlu0 %933 }
  0xab   : > { %v619_v43 = vsub.f32 %v608_v38, %v1116_v21  ;;  %v634_v51 = vsub.f32 %v623_v46, %v1117_v35 }
  0xac   : > { %v620_v44 = vsub.f32 %v609_v39, %v1116_v21  ;;  %1150 = vmatprep.mubr.msk.bf16.mxu0 %vm672_vm8, %v664_v40  ;;  %v635_v50 = vsub.f32 %v624_v45, %v1117_v35  ;;  %v939_v45 = vpop.permute.xlu1 %938 }
  0xae   : > { %v665_v48 = vpack.c.bf16 %v620_v44, %v619_v43  ;;  %v810_v52 = vpack.c.bf16 %v635_v50, %v634_v51  ;;  %v1123_v44 = vld [vmem:[%s1425_s10] ss:$0 sm:$0xff] }
  0xb0   : > { %1151 = vmatmul.mubr.msk.bf16.vlgmr.msra.gmra.mxu0 %vm672_vm8, %v665_v48 }
  0xb1   : > { %1163 = vmatpush3.bf16.msra.mxu0 %v1292_v47  ;;  %1164 = vmatprep.mubr.msk.bf16.mxu0 %vm672_vm8, %v809_v49  ;;  %v1118_v47 = vld [vmem:[%s1422_s7] ss:$0 sm:$0xff] }
  0xb2   : > { %v651_v56 = vmul.f32 %v1118_v47, %v1321_v0  ;;  %v649_v58 = vmul.f32 %v1118_v47, %v1297_v55  ;;  %v652_v59 = vmul.f32 %v1118_v47, %v1328_v4  ;;  %v650_v5 = vmul.f32 %v1118_v47, %v1299_v57 }
  0xb4   : > { %v662_v6 = vadd.f32 %v1119_v1, %v651_v56  ;;  %v660_v13 = vadd.f32 %v1119_v1, %v649_v58  ;;  %v663_v15 = vadd.f32 %v1119_v1, %v652_v59  ;;  %v661_v0 = vadd.f32 %v1119_v1, %v650_v5  ;;  %v949_v5 = vpop.permute.xlu1 %948 }
  0xb5   : > { %v928_v59 = vsub.f32 %v1313_v62, %v1315_v63  ;;  %v929_v1 = vsub.f32 %v1326_v3, %v1337_v9  ;;  %v954_v3 = vmul.f32 %v949_v5, %v1355_v24 }
  0xb8   : > { %1165 = vmatmul.mubr.msk.bf16.vlgmr.msra.gmra.mxu0 %vm672_vm8, %v810_v52  ;;  %v944_v52 = vpop.permute.xlu0 %943 }
 0x170   : > { %v1152_v2 = vpop.f32.mrf.mxu0 }
 0x171   : > { %v722_v12 = vadd.f32 %v1152_v2, %v662_v6  ;;  %v951_v2 = vmul.f32 %v934_v42, %v1333_v7 }
 0x172   : > { %v713_v11 = vpop.f32.mrf.mxu0 }
 0x173   : > { %v714_v17 = vadd.f32 %v713_v11, %v660_v13  ;;  %v730_v55 = vmax.f32 %v722_v12, 0.0  ;;  %v953_v12 = vmul.f32 %v944_v52, %v1353_v22 }
 0x174   : > { %v1153_v16 = vpop.f32.mrf.mxu0 }
 0x175   : > { %v725_v18 = vadd.f32 %v1153_v16, %v663_v15  ;;  %v728_v23 = vmax.f32 %v714_v17, 0.0 }
 0x176   : > { %v716_v19 = vpop.f32.mrf.mxu0 }
 0x177   : > { %v731_v20 = vmax.f32 %v725_v18, 0.0  ;;  %v717_v4 = vadd.f32 %v716_v19, %v661_v0 }
 0x178   : > { %v1166_v21 = vpop.f32.mrf.mxu0 }
 0x179   : > { %v733_v25 = vpack.c.bf16 %v731_v20, %v730_v55  ;;  %v729_v26 = vmax.f32 %v717_v4, 0.0  ;;  %v860_v57 = vadd.f32 %v1166_v21, %v662_v6  ;;  %v973_v55 = vadd.f32 %v953_v12, %v929_v1 }
 0x17a   : > { %v851_v27 = vpop.f32.mrf.mxu0 }
 0x17b   : > { %v732_v28 = vpack.c.bf16 %v729_v26, %v728_v23  ;;  %v852_v30 = vadd.f32 %v851_v27, %v660_v13  ;;  %v868_v33 = vmax.f32 %v860_v57, 0.0 }
 0x17c   : > { %v1167_v29 = vpop.f32.mrf.mxu0 }
 0x17d   : > { %v863_v31 = vadd.f32 %v1167_v29, %v663_v15  ;;  %1158 = vmatprep.mubr.msk.bf16.mxu1 %vm753_vm9, %v732_v28  ;;  %v866_v36 = vmax.f32 %v852_v30, 0.0  ;;  %v985_v29 = vsub.f32 %v929_v1, %v953_v12 }
 0x17e   : > { %1159 = vmatmul.mubr.msk.bf16.vlgmr.msra.gmra.mxu1 %vm753_vm9, %v733_v25  ;;  %v854_v32 = vpop.f32.mrf.mxu0 }
 0x17f   : > { %v869_v34 = vmax.f32 %v863_v31, 0.0  ;;  %v855_v35 = vadd.f32 %v854_v32, %v661_v0  ;;  %1169 = vmatpush3.bf16.msra.mxu1 %v1190_v53 }
 0x180   : > { %1170 = vmatprep.subr.bf16.mxu1 %v1191_v54 }
 0x181   : > { %v871_v37 = vpack.c.bf16 %v869_v34, %v868_v33  ;;  %v867_v38 = vmax.f32 %v855_v35, 0.0 }
 0x183   : > { %v870_v39 = vpack.c.bf16 %v867_v38, %v866_v36  ;;  %1171 = vmatpush3.bf16.msra.mxu1 %v1191_v54  ;;  %v927_v54 = vsub.f32 %v1309_v60, %v1311_v61  ;;  %v930_v60 = vsub.f32 %v1335_v8, %v1343_v14  ;;  %v952_v61 = vmul.f32 %v939_v45, %v1339_v10 }
 0x185   : > { %1172 = vmatprep.mubr.msk.bf16.mxu1 %vm753_vm9, %v870_v39  ;;  %v971_v0 = vadd.f32 %v951_v2, %v927_v54  ;;  %v972_v8 = vadd.f32 %v952_v61, %v928_v59  ;;  %v983_v14 = vsub.f32 %v927_v54, %v951_v2  ;;  %v974_v10 = vadd.f32 %v954_v3, %v930_v60 }
 0x186   : > { %1173 = vmatmul.mubr.msk.bf16.vlgmr.msra.gmra.mxu1 %vm753_vm9, %v871_v37  ;;  %v984_v24 = vsub.f32 %v928_v59, %v952_v61  ;;  %v986_v35 = vsub.f32 %v930_v60, %v954_v3 }
 0x23e   : > { %v1160_v40 = vpop.f32.mrf.mxu1 }
 0x23f   : > { %v803_v48 = vadd.f32 %v1160_v40, %v1123_v44 }
 0x240   : > { %v794_v41 = vpop.f32.mrf.mxu1 }
 0x241   : > { %v795_v50 = vadd.f32 %v1123_v44, %v794_v41  ;;  %v957_v6 = vmul.f32 %v803_v48, %v803_v48  ;;  %v977_v26 = vmul.f32 %v973_v55, %v803_v48 }
 0x242   : > { %v1161_v43 = vpop.f32.mrf.mxu1 }
 0x243   : > { %v806_v47 = vadd.f32 %v1161_v43, %v1123_v44  ;;  %v955_v13 = vmul.f32 %v795_v50, %v795_v50  ;;  %v975_v4 = vmul.f32 %v971_v0, %v795_v50 }
 0x244   : > { %v797_v46 = vpop.f32.mrf.mxu1 }
 0x245   : > { %v798_v17 = vadd.f32 %v1123_v44, %v797_v46  ;;  %v958_v9 = vmul.f32 %v806_v47, %v806_v47  ;;  %v978_v30 = vmul.f32 %v974_v10, %v806_v47 }
 0x246   : > { %v1174_v49 = vpop.f32.mrf.mxu1 }
 0x247   : > { %v921_v51 = vadd.f32 %v1174_v49, %v1123_v44  ;;  %v956_v21 = vmul.f32 %v798_v17, %v798_v17  ;;  %v976_v31 = vmul.f32 %v972_v8, %v798_v17 }
 0x248   : > { %v912_v53 = vpop.f32.mrf.mxu1 }
 0x249   : > { %v961_v56 = vmul.f32 %v921_v51, %v921_v51  ;;  %v913_v58 = vadd.f32 %v1123_v44, %v912_v53  ;;  %v989_v36 = vmul.f32 %v985_v29, %v921_v51 }
 0x24a   : > { %v1175_v11 = vpop.f32.mrf.mxu1 }
 0x24b   : > { %v959_v15 = vmul.f32 %v913_v58, %v913_v58  ;;  %v924_v16 = vadd.f32 %v1175_v11, %v1123_v44  ;;  %v965_v62 = vadd.f32 %v961_v56, %v957_v6  ;;  %v987_v33 = vmul.f32 %v983_v14, %v913_v58 }
 0x24c   : > { %v915_v63 = vpop.f32.mrf.mxu1 }
 0x24d   : > { %v963_v7 = vadd.f32 %v959_v15, %v955_v13  ;;  %v962_v18 = vmul.f32 %v924_v16, %v924_v16  ;;  %v916_v19 = vadd.f32 %v1123_v44, %v915_v63  ;;  %v969_v23 = vmul.f32 0.5, %v965_v62 }
 0x24e   : > { %v990_v42 = vmul.f32 %v986_v35, %v924_v16 }
 0x24f   : > { %v967_v22 = vmul.f32 0.5, %v963_v7  ;;  %v966_v20 = vadd.f32 %v962_v18, %v958_v9  ;;  %v960_v25 = vmul.f32 %v916_v19, %v916_v19  ;;  %v981_v32 = vsub.f32 %v969_v23, %v977_v26 }
 0x250   : > { %v988_v39 = vmul.f32 %v984_v24, %v916_v19 }
 0x251   : > { %v979_v27 = vsub.f32 %v967_v22, %v975_v4  ;;  %v970_v57 = vmul.f32 0.5, %v966_v20  ;;  %v964_v28 = vadd.f32 %v960_v25, %v956_v21  ;;  %v993_v41 = vsub.f32 %v981_v32, %v989_v36 }
 0x253   : > { %v968_v34 = vmul.f32 0.5, %v964_v28  ;;  %v991_v37 = vsub.f32 %v979_v27, %v987_v33  ;;  %v982_v40 = vsub.f32 %v970_v57, %v978_v30  ;;  %v998_v49 = vsel %vm672_vm8, %v993_v41, 0.0 }
 0x255   : > { %v980_v38 = vsub.f32 %v968_v34, %v976_v31  ;;  %v994_v44 = vsub.f32 %v982_v40, %v990_v42  ;;  %v995_v45 = vsel %vm672_vm8, %v991_v37, 0.0 }
 0x257   : > { %v992_v43 = vsub.f32 %v980_v38, %v988_v39  ;;  %v1000_v51 = vsel %vm672_vm8, %v994_v44, 0.0 }
 0x259   : > { %v996_v46 = vsel %vm672_vm8, %v992_v43, 0.0 }
 0x25a   : > { %v997_v48 = vadd.f32 %v996_v46, %v995_v45 }
 0x25c   : > { %v999_v50 = vadd.f32 %v998_v49, %v997_v48 }
 0x25e   : > { %v1001_v52 = vadd.f32 %v1000_v51, %v999_v50 }
 0x260   : > { %1002 = vadd.xlane.f32.xlu0 %v1001_v52 }
 0x2e9   : > { %v1003_v53 = vpop.xlane.xlu0 %1002 }
 0x2ea   : > { %v1004_v54 = vrot.slane %v1003_v53, 4 }
 0x2ec   : > { %v1005_v47 = vadd.f32 %v1004_v54, %v1003_v53 }
 0x2ee   : > { %v1006_v56 = vrot.slane %v1005_v47, 2 }
 0x2f0   : > { %v1007_v58 = vadd.f32 %v1006_v56, %v1005_v47 }
 0x2f2   : > { %v1008_v59 = vrot.slane %v1007_v58, 1 }
 0x2f4   : > { %v1009_v1 = vadd.f32 %v1008_v59, %v1007_v58 }
 0x2f6   : > { %1176 = vpush %v1009_v1 }
 0x327   : > { %s1177_s19 = spop %1176 }
 0x328   : > { %v1011_v2 = vstv %s1177_s19 }
 0x329   : > { %1012 = vst [vmem:[%s452_s16] sm:$0xff] %v1011_v2 }
 0x32a PF: > { %s21_s17 = sadd.s32 1, %s1206_s17  }
 0x32b   : > { %p18_p5 = scmp.ge.s32.totalorder %s21_s17, 6  }
 0x32d   :  { %20 = sbr.rel (!%p18_p5) target bundleno = 1 (0x1), region = 103 }

</bundles_post_ra>
